<compile_context>
chip_gen: v7x
topology: tpu7x:2x2x1
jax: 0.10.0
libtpu: 0.0.40
codegen_flags: <defaults>
</compile_context>

<pallas_src>
import functools

import jax
import jax.numpy as jnp
from jax.experimental import pallas as pl
from jax.experimental.pallas import tpu as pltpu

EPS = 1e-5          # nn.BatchNorm1d default eps
NEG_SLOPE = 0.01    # nn.LeakyReLU default negative_slope
CLIP_MAX = 100.0


# ---------------------------------------------------------------------------
# Hardware-aware knobs
# ---------------------------------------------------------------------------
def _vmem_capacity_bytes():
    """Physical VMEM per TensorCore for the attached generation."""
    try:
        return int(pltpu.get_tpu_info().vmem_capacity_bytes)
    except Exception:
        try:
            kind = jax.devices()[0].device_kind.lower()
        except Exception:
            kind = ""
        return (64 if "v7" in kind else 128) * 1024 * 1024


def _act_dtype():
    """Storage dtype for the BN+LeakyReLU activations.

    v6e/v7x have a bf16 VALU, so bf16 activations halve the live footprint and
    feed the next MXU matmul with no extra cast copy; v5e keeps f32 (no bf16
    VALU/EUP). BN statistics and rsqrt stay f32 on every generation.
    """
    try:
        kind = jax.devices()[0].device_kind.lower()
    except Exception:
        return jnp.float32
    return jnp.float32 if "v5" in kind else jnp.bfloat16


def _resident_bytes(B, d_in, H):
    """Rough VMEM working set of the whole-batch-resident fused kernel."""
    return (
        B * d_in * (4 + 2)            # x (f32) + bf16 MXU copy
        + 2 * B * H * (4 + 2)         # h1/h2 f32 accumulators + activation copies
        + B * 4 * 2                   # fc3 column + lane-dense output row
        + (d_in * H + H * H) * 2      # bf16 weights
        + 8 * H * 4                   # biases / gamma / beta / w3 / stat rows
    )


def _pick_batch_tile(B):
    # Largest lane-aligned (multiple of 128) tile that divides B: fewer grid
    # steps (~0.35 us each) and a lane-dense (1, tile) output block.
    for tb in (4096, 2048, 1024, 512, 256, 128):
        if B % tb == 0:
            return tb
    return None


# ---------------------------------------------------------------------------
# Resident (whole batch in VMEM) fused kernel
# ---------------------------------------------------------------------------
def _bn_leaky(h, gamma, beta, act_dtype):
    """BatchNorm1d (training-mode batch stats) + LeakyReLU; stats in f32."""
    mean = jnp.mean(h, axis=0, keepdims=True)
    d = h - mean
    # Centered variance (PyTorch's E[(h-mean)^2]): `d` is needed for the
    # normalization anyway, so this is no extra pass vs E[h^2]-E[h]^2 and
    # avoids its cancellation.
    var = jnp.mean(d * d, axis=0, keepdims=True)
    a = d * (jax.lax.rsqrt(var + EPS) * gamma) + beta
    # LeakyReLU as a single max (valid for 0 <= slope <= 1): mul+max instead
    # of cmp+mul+select.
    return jnp.maximum(a, NEG_SLOPE * a).astype(act_dtype)


def _mlp_resident_kernel(x_ref, w1_ref, b1_ref, g1_ref, be1_ref,
                         w2_ref, b2_ref, g2_ref, be2_ref, w3_ref, b3_ref,
                         o_ref, *, act_dtype):
    # fc1: bf16 operands into the MXU, f32 accumulation.
    h1 = jnp.dot(x_ref[...].astype(jnp.bfloat16), w1_ref[...],
                 preferred_element_type=jnp.float32) + b1_ref[...]
    a1 = _bn_leaky(h1, g1_ref[...], be1_ref[...], act_dtype)

    # fc2: same bf16-in / f32-accumulate pattern; BN stats from the f32 result.
    h2 = jnp.dot(a1.astype(jnp.bfloat16), w2_ref[...],
                 preferred_element_type=jnp.float32) + b2_ref[...]
    a2 = _bn_leaky(h2, g2_ref[...], be2_ref[...], act_dtype)

    # fc3 has output width 1: VPU broadcast-mul + lane reduce instead of a
    # <1%-column-utilized MXU matmul (f32 via promotion against the f32 w3 row).
    col = jnp.sum(a2 * w3_ref[...], axis=-1, keepdims=True) + b3_ref[...]
    # clamp(max=100); store lane-dense (batch on the lane axis).
    o_ref[...] = jnp.minimum(col, CLIP_MAX).T


def _resident_forward(x, params, act_dtype):
    (w1, b1, g1, be1, w2, b2, g2, be2, w3, b3) = params
    B, d_in = x.shape
    H = w1.shape[1]

    vmem_cap = _vmem_capacity_bytes()
    est = _resident_bytes(B, d_in, H)
    # Never set the scoped-VMEM limit below the working set; keep headroom for
    # Mosaic internal scratch below the physical per-generation capacity.
    limit = int(min(max(1.25 * est, 32 * 1024 * 1024), vmem_cap - 16 * 1024 * 1024))

    vmem = pl.BlockSpec(memory_space=pltpu.MemorySpace.VMEM)
    out_row = pl.pallas_call(
        functools.partial(_mlp_resident_kernel, act_dtype=act_dtype),
        out_shape=jax.ShapeDtypeStruct((1, B), jnp.float32),
        in_specs=[vmem] * 11,
        out_specs=vmem,
        compiler_params=pltpu.CompilerParams(vmem_limit_bytes=limit),
    )(x, w1, b1, g1, be1, w2, b2, g2, be2, w3, b3)
    return out_row.reshape(B, 1)


# ---------------------------------------------------------------------------
# Batch-tiled two-pass-BN pipeline (for batches that do not fit VMEM)
# ---------------------------------------------------------------------------
def _fc1_stats_kernel(x_ref, w1_ref, b1_ref, h1_ref, s_ref, q_ref):
    h = jnp.dot(x_ref[...].astype(jnp.bfloat16), w1_ref[...],
                preferred_element_type=jnp.float32) + b1_ref[...]
    h1_ref[...] = h.astype(h1_ref.dtype)
    s_ref[...] = jnp.sum(h, axis=0, keepdims=True)        # per-tile partial sum
    q_ref[...] = jnp.sum(h * h, axis=0, keepdims=True)    # per-tile partial sumsq


def _bn_fc2_stats_kernel(h1_ref, sc_ref, sh_ref, w2_ref, b2_ref,
                         h2_ref, s_ref, q_ref):
    a = h1_ref[...].astype(jnp.float32) * sc_ref[...] + sh_ref[...]
    a = jnp.maximum(a, NEG_SLOPE * a)
    h = jnp.dot(a.astype(jnp.bfloat16), w2_ref[...],
                preferred_element_type=jnp.float32) + b2_ref[...]
    h2_ref[...] = h.astype(h2_ref.dtype)
    s_ref[...] = jnp.sum(h, axis=0, keepdims=True)
    q_ref[...] = jnp.sum(h * h, axis=0, keepdims=True)


def _bn_fc3_kernel(h2_ref, sc_ref, sh_ref, w3_ref, b3_ref, o_ref):
    a = h2_ref[...].astype(jnp.float32) * sc_ref[...] + sh_ref[...]
    a = jnp.maximum(a, NEG_SLOPE * a)
    col = jnp.sum(a * w3_ref[...], axis=-1, keepdims=True) + b3_ref[...]
    o_ref[...] = jnp.minimum(col, CLIP_MAX).T              # lane-dense (1, TB) store


def _tiled_forward(x, params, tb, act_dtype):
    (w1, b1, g1, be1, w2, b2, g2, be2, w3, b3) = params
    B, d_in = x.shape
    H = w1.shape[1]
    assert B % tb == 0 and tb % 128 == 0, "batch tile must be a 128-multiple dividing B"
    nt = B // tb

    parallel = pltpu.CompilerParams(dimension_semantics=("parallel",))

    def _const(shape):
        # Constant index_map -> the block is DMA'd once and stays VMEM-resident
        # across all batch tiles (weights, biases, folded BN scale/shift).
        return pl.BlockSpec(shape, lambda i: (0, 0))

    row_spec = pl.BlockSpec((tb, H), lambda i: (i, 0))
    stat_spec = pl.BlockSpec((None, 1, H), lambda i: (i, 0, 0))
    stat_shape = jax.ShapeDtypeStruct((nt, 1, H), jnp.float32)

    def _finalize(sums, sumsqs, gamma, beta):
        # Tiny (1, H) reductions: ordinary XLA between the pipelined passes.
        mean = jnp.sum(sums, axis=0) / B
        var = jnp.maximum(jnp.sum(sumsqs, axis=0) / B - mean * mean, 0.0)
        scale = jax.lax.rsqrt(var + EPS) * gamma           # fold BN affine
        return scale, beta - mean * scale

    # Pass 1: fc1 + per-tile BN1 partial sums.
    h1, s1, q1 = pl.pallas_call(
        _fc1_stats_kernel,
        grid=(nt,),
        in_specs=[pl.BlockSpec((tb, d_in), lambda i: (i, 0)),
                  _const((d_in, H)), _const((1, H))],
        out_specs=[row_spec, stat_spec, stat_spec],
        out_shape=[jax.ShapeDtypeStruct((B, H), act_dtype), stat_shape, stat_shape],
        compiler_params=parallel,
    )(x, w1, b1)
    scale1, shift1 = _finalize(s1, q1, g1, be1)

    # Pass 2: BN1 + LeakyReLU + fc2 + per-tile BN2 partial sums.
    h2, s2, q2 = pl.pallas_call(
        _bn_fc2_stats_kernel,
        grid=(nt,),
        in_specs=[row_spec, _const((1, H)), _const((1, H)),
                  _const((H, H)), _const((1, H))],
        out_specs=[row_spec, stat_spec, stat_spec],
        out_shape=[jax.ShapeDtypeStruct((B, H), act_dtype), stat_shape, stat_shape],
        compiler_params=parallel,
    )(h1, scale1, shift1, w2, b2)
    scale2, shift2 = _finalize(s2, q2, g2, be2)

    # Pass 3: BN2 + LeakyReLU + fc3 + clamp; lane-dense (1, B) output.
    out_row = pl.pallas_call(
        _bn_fc3_kernel,
        grid=(nt,),
        in_specs=[row_spec, _const((1, H)), _const((1, H)),
                  _const((1, H)), _const((1, 1))],
        out_specs=pl.BlockSpec((1, tb), lambda i: (0, i)),
        out_shape=jax.ShapeDtypeStruct((1, B), jnp.float32),
        compiler_params=parallel,
    )(h2, scale2, shift2, w3, b3)
    return out_row.reshape(B, 1)


# ---------------------------------------------------------------------------
# Public wrapper
# ---------------------------------------------------------------------------
def neural_network_forward(x, params, *, batch_tile=None):
    """Forward pass of the NeuralNetwork module.

    batch_tile=None  -> pick automatically: whole-batch VMEM-resident fused
                        kernel when it fits the attached generation's VMEM
                        (minus headroom), otherwise the batch-tiled pipeline.
    batch_tile=<int> -> force the tiled pipeline with this tile size
                        (multiple of 128 that divides the batch).
    """
    B, d_in = x.shape
    H = params[0].shape[1]
    act_dtype = _act_dtype()

    if batch_tile is None:
        est = _resident_bytes(B, d_in, H)
        # Generation-aware resident ceiling (~24 MiB Mosaic/DMA headroom):
        # ~104 MiB on v5e/v6e (128 MiB VMEM), ~40 MiB on v7x (64 MiB VMEM).
        if est <= _vmem_capacity_bytes() - 24 * 1024 * 1024:
            return _resident_forward(x, params, act_dtype)
        batch_tile = _pick_batch_tile(B)
        if batch_tile is None:
            # TODO(synk): batches that neither fit VMEM nor divide by a
            # 128-multiple tile would need padded tiles + masked BN stats.
            return _resident_forward(x, params, act_dtype)
    return _tiled_forward(x, params, batch_tile, act_dtype)


# ---------------------------------------------------------------------------
# Parameter init (mirrors the module __init__)
# ---------------------------------------------------------------------------
def xavier_uniform(key, fan_in, fan_out):
    # nn.init.xavier_uniform_ (gain=1): U(-a, a), a = sqrt(6 / (fan_in + fan_out)).
    a = (6.0 / (fan_in + fan_out)) ** 0.5
    return jax.random.uniform(key, (fan_in, fan_out), jnp.float32, -a, a)


def init_params(key, input_size, hidden_size):
    k1, k2, k3, kb1, kb2, kb3 = jax.random.split(key, 6)
    # fc1/fc2 weights: xavier_uniform_ (as in the module), stored (in, out) so
    # kernels compute x @ W + b; kept bf16 for the MXU (f32 accumulation).
    # NOTE: if this model is ever sized up, pad input/hidden with zeros to
    # >=128 (lane) / 256-multiples (v6e/v7x MXU) at init.
    w1 = xavier_uniform(k1, input_size, hidden_size).astype(jnp.bfloat16)
    w2 = xavier_uniform(k2, hidden_size, hidden_size).astype(jnp.bfloat16)
    # Remaining Linear params: PyTorch default U(-1/sqrt(fan_in), 1/sqrt(fan_in)).
    bnd1 = 1.0 / (input_size ** 0.5)
    bnd2 = 1.0 / (hidden_size ** 0.5)
    b1 = jax.random.uniform(kb1, (1, hidden_size), jnp.float32, -bnd1, bnd1)
    b2 = jax.random.uniform(kb2, (1, hidden_size), jnp.float32, -bnd2, bnd2)
    # fc3 weight stored as a (1, hidden) row for the VPU-reduce fc3.
    w3 = jax.random.uniform(k3, (1, hidden_size), jnp.float32, -bnd2, bnd2)
    b3 = jax.random.uniform(kb3, (1, 1), jnp.float32, -bnd2, bnd2)
    # BatchNorm1d affine parameters (gamma=1, beta=0 at init, as in PyTorch).
    g1 = jnp.ones((1, hidden_size), jnp.float32)
    be1 = jnp.zeros((1, hidden_size), jnp.float32)
    g2 = jnp.ones((1, hidden_size), jnp.float32)
    be2 = jnp.zeros((1, hidden_size), jnp.float32)
    return (w1, b1, g1, be1, w2, b2, g2, be2, w3, b3)


if __name__ == "__main__":
    key = jax.random.PRNGKey(0)
    kx, kx2, kp = jax.random.split(key, 3)

    batch, input_size, hidden_size = 8, 16, 32
    x = jax.random.normal(kx, (batch, input_size), jnp.float32)
    params = init_params(kp, input_size, hidden_size)

    fwd = jax.jit(neural_network_forward, static_argnames=("batch_tile",))

    # Small batch: VMEM-resident fused kernel.
    out = fwd(x, params)
    jax.block_until_ready(out)
    assert out.shape == (batch, 1) and out.dtype == jnp.float32
    assert bool(jnp.all(jnp.isfinite(out)))
    assert bool(jnp.all(out <= CLIP_MAX))

    # Also exercise the batch-tiled two-pass-BN pipeline and cross-check it
    # against the resident path on the same (larger) inputs.
    big_batch = 256
    xb = jax.random.normal(kx2, (big_batch, input_size), jnp.float32)
    out_resident = fwd(xb, params)                     # fits VMEM -> resident
    out_tiled = fwd(xb, params, batch_tile=128)        # forced tiled, grid=(2,)
    jax.block_until_ready((out_resident, out_tiled))
    assert out_tiled.shape == (big_batch, 1)
    assert bool(jnp.allclose(out_resident, out_tiled, atol=1e-1, rtol=1e-1))

    print("KERNEL_OK")
</pallas_src>

<mosaic_0001>
module attributes {stable_mosaic.version = 11 : i64} {
  func.func @_mlp_resident_kernel(%arg0: memref<8x16xf32, #tpu.memory_space<vmem>>, %arg1: memref<16x32xbf16, #tpu.memory_space<vmem>>, %arg2: memref<1x32xf32, #tpu.memory_space<vmem>>, %arg3: memref<1x32xf32, #tpu.memory_space<vmem>>, %arg4: memref<1x32xf32, #tpu.memory_space<vmem>>, %arg5: memref<32x32xbf16, #tpu.memory_space<vmem>>, %arg6: memref<1x32xf32, #tpu.memory_space<vmem>>, %arg7: memref<1x32xf32, #tpu.memory_space<vmem>>, %arg8: memref<1x32xf32, #tpu.memory_space<vmem>>, %arg9: memref<1x32xf32, #tpu.memory_space<vmem>>, %arg10: memref<1x1xf32, #tpu.memory_space<vmem>>, %arg11: memref<1x8xf32, #tpu.memory_space<vmem>>) attributes {dimension_semantics = [], scalar_prefetch = 0 : i64, scratch_operands = 0 : i64, tpu.core_type = #tpu.core_type<tc>} {
    %c0 = arith.constant 0 : index
    %c0_0 = arith.constant 0 : index
    %0 = vector.load %arg0[%c0, %c0_0] : memref<8x16xf32, #tpu.memory_space<vmem>>, vector<8x16xf32>
    %1 = arith.truncf %0 : vector<8x16xf32> to vector<8x16xbf16>
    %c0_1 = arith.constant 0 : index
    %c0_2 = arith.constant 0 : index
    %2 = vector.load %arg1[%c0_1, %c0_2] : memref<16x32xbf16, #tpu.memory_space<vmem>>, vector<16x32xbf16>
    %cst = arith.constant dense<0.000000e+00> : vector<8x32xf32>
    %3 = tpu.matmul %1, %2, %cst {dimension_numbers = #tpu.dot_dimension_numbers<[1], [0], [0], [1], [0, 0, 1, 1], [], []>} : vector<8x16xbf16>, vector<16x32xbf16>, vector<8x32xf32> -> vector<8x32xf32>
    %c0_3 = arith.constant 0 : index
    %c0_4 = arith.constant 0 : index
    %4 = vector.load %arg2[%c0_3, %c0_4] : memref<1x32xf32, #tpu.memory_space<vmem>>, vector<1x32xf32>
    %5 = vector.broadcast %4 : vector<1x32xf32> to vector<8x32xf32>
    %6 = arith.addf %3, %5 : vector<8x32xf32>
    %c0_5 = arith.constant 0 : index
    %c0_6 = arith.constant 0 : index
    %7 = vector.load %arg3[%c0_5, %c0_6] : memref<1x32xf32, #tpu.memory_space<vmem>>, vector<1x32xf32>
    %c0_7 = arith.constant 0 : index
    %c0_8 = arith.constant 0 : index
    %8 = vector.load %arg4[%c0_7, %c0_8] : memref<1x32xf32, #tpu.memory_space<vmem>>, vector<1x32xf32>
    %cst_9 = arith.constant dense<0.000000e+00> : vector<32xf32>
    %9 = vector.multi_reduction <add>, %6, %cst_9 [0] : vector<8x32xf32> to vector<32xf32>
    %10 = vector.shape_cast %9 : vector<32xf32> to vector<1x32xf32>
    %cst_10 = arith.constant 8.000000e+00 : f32
    %11 = vector.broadcast %cst_10 : f32 to vector<1x32xf32>
    %12 = arith.divf %10, %11 : vector<1x32xf32>
    %13 = vector.broadcast %12 : vector<1x32xf32> to vector<8x32xf32>
    %14 = arith.subf %6, %13 : vector<8x32xf32>
    %15 = arith.mulf %14, %14 : vector<8x32xf32>
    %cst_11 = arith.constant dense<0.000000e+00> : vector<32xf32>
    %16 = vector.multi_reduction <add>, %15, %cst_11 [0] : vector<8x32xf32> to vector<32xf32>
    %17 = vector.shape_cast %16 : vector<32xf32> to vector<1x32xf32>
    %cst_12 = arith.constant 8.000000e+00 : f32
    %18 = vector.broadcast %cst_12 : f32 to vector<1x32xf32>
    %19 = arith.divf %17, %18 : vector<1x32xf32>
    %cst_13 = arith.constant 9.99999974E-6 : f32
    %20 = vector.broadcast %cst_13 : f32 to vector<1x32xf32>
    %21 = arith.addf %19, %20 : vector<1x32xf32>
    %22 = math.rsqrt %21 : vector<1x32xf32>
    %23 = arith.mulf %22, %7 : vector<1x32xf32>
    %24 = vector.broadcast %23 : vector<1x32xf32> to vector<8x32xf32>
    %25 = arith.mulf %14, %24 : vector<8x32xf32>
    %26 = vector.broadcast %8 : vector<1x32xf32> to vector<8x32xf32>
    %27 = arith.addf %25, %26 : vector<8x32xf32>
    %cst_14 = arith.constant 0.00999999977 : f32
    %28 = vector.broadcast %cst_14 : f32 to vector<8x32xf32>
    %29 = arith.mulf %28, %27 : vector<8x32xf32>
    %30 = arith.maximumf %27, %29 : vector<8x32xf32>
    %31 = arith.truncf %30 : vector<8x32xf32> to vector<8x32xbf16>
    %c0_15 = arith.constant 0 : index
    %c0_16 = arith.constant 0 : index
    %32 = vector.load %arg5[%c0_15, %c0_16] : memref<32x32xbf16, #tpu.memory_space<vmem>>, vector<32x32xbf16>
    %cst_17 = arith.constant dense<0.000000e+00> : vector<8x32xf32>
    %33 = tpu.matmul %31, %32, %cst_17 {dimension_numbers = #tpu.dot_dimension_numbers<[1], [0], [0], [1], [0, 0, 1, 1], [], []>} : vector<8x32xbf16>, vector<32x32xbf16>, vector<8x32xf32> -> vector<8x32xf32>
    %c0_18 = arith.constant 0 : index
    %c0_19 = arith.constant 0 : index
    %34 = vector.load %arg6[%c0_18, %c0_19] : memref<1x32xf32, #tpu.memory_space<vmem>>, vector<1x32xf32>
    %35 = vector.broadcast %34 : vector<1x32xf32> to vector<8x32xf32>
    %36 = arith.addf %33, %35 : vector<8x32xf32>
    %c0_20 = arith.constant 0 : index
    %c0_21 = arith.constant 0 : index
    %37 = vector.load %arg7[%c0_20, %c0_21] : memref<1x32xf32, #tpu.memory_space<vmem>>, vector<1x32xf32>
    %c0_22 = arith.constant 0 : index
    %c0_23 = arith.constant 0 : index
    %38 = vector.load %arg8[%c0_22, %c0_23] : memref<1x32xf32, #tpu.memory_space<vmem>>, vector<1x32xf32>
    %cst_24 = arith.constant dense<0.000000e+00> : vector<32xf32>
    %39 = vector.multi_reduction <add>, %36, %cst_24 [0] : vector<8x32xf32> to vector<32xf32>
    %40 = vector.shape_cast %39 : vector<32xf32> to vector<1x32xf32>
    %cst_25 = arith.constant 8.000000e+00 : f32
    %41 = vector.broadcast %cst_25 : f32 to vector<1x32xf32>
    %42 = arith.divf %40, %41 : vector<1x32xf32>
    %43 = vector.broadcast %42 : vector<1x32xf32> to vector<8x32xf32>
    %44 = arith.subf %36, %43 : vector<8x32xf32>
    %45 = arith.mulf %44, %44 : vector<8x32xf32>
    %cst_26 = arith.constant dense<0.000000e+00> : vector<32xf32>
    %46 = vector.multi_reduction <add>, %45, %cst_26 [0] : vector<8x32xf32> to vector<32xf32>
    %47 = vector.shape_cast %46 : vector<32xf32> to vector<1x32xf32>
    %cst_27 = arith.constant 8.000000e+00 : f32
    %48 = vector.broadcast %cst_27 : f32 to vector<1x32xf32>
    %49 = arith.divf %47, %48 : vector<1x32xf32>
    %cst_28 = arith.constant 9.99999974E-6 : f32
    %50 = vector.broadcast %cst_28 : f32 to vector<1x32xf32>
    %51 = arith.addf %49, %50 : vector<1x32xf32>
    %52 = math.rsqrt %51 : vector<1x32xf32>
    %53 = arith.mulf %52, %37 : vector<1x32xf32>
    %54 = vector.broadcast %53 : vector<1x32xf32> to vector<8x32xf32>
    %55 = arith.mulf %44, %54 : vector<8x32xf32>
    %56 = vector.broadcast %38 : vector<1x32xf32> to vector<8x32xf32>
    %57 = arith.addf %55, %56 : vector<8x32xf32>
    %cst_29 = arith.constant 0.00999999977 : f32
    %58 = vector.broadcast %cst_29 : f32 to vector<8x32xf32>
    %59 = arith.mulf %58, %57 : vector<8x32xf32>
    %60 = arith.maximumf %57, %59 : vector<8x32xf32>
    %61 = arith.truncf %60 : vector<8x32xf32> to vector<8x32xbf16>
    %c0_30 = arith.constant 0 : index
    %c0_31 = arith.constant 0 : index
    %62 = vector.load %arg9[%c0_30, %c0_31] : memref<1x32xf32, #tpu.memory_space<vmem>>, vector<1x32xf32>
    %63 = arith.extf %61 : vector<8x32xbf16> to vector<8x32xf32>
    %64 = vector.broadcast %62 : vector<1x32xf32> to vector<8x32xf32>
    %65 = arith.mulf %63, %64 : vector<8x32xf32>
    %cst_32 = arith.constant dense<0.000000e+00> : vector<8xf32>
    %66 = vector.multi_reduction <add>, %65, %cst_32 [1] : vector<8x32xf32> to vector<8xf32>
    %67 = vector.shape_cast %66 : vector<8xf32> to vector<8x1xf32>
    %c0_33 = arith.constant 0 : index
    %c0_34 = arith.constant 0 : index
    %68 = vector.load %arg10[%c0_33, %c0_34] : memref<1x1xf32, #tpu.memory_space<vmem>>, vector<1x1xf32>
    %69 = vector.broadcast %68 : vector<1x1xf32> to vector<8x1xf32>
    %70 = arith.addf %67, %69 : vector<8x1xf32>
    %cst_35 = arith.constant 1.000000e+02 : f32
    %71 = vector.broadcast %cst_35 : f32 to vector<8x1xf32>
    %72 = arith.minimumf %70, %71 : vector<8x1xf32>
    %73 = tpu.transpose %72, [1, 0] : vector<8x1xf32> -> vector<1x8xf32>
    %c0_36 = arith.constant 0 : index
    %c0_37 = arith.constant 0 : index
    %74 = vector.load %arg11[%c0_36, %c0_37] : memref<1x8xf32, #tpu.memory_space<vmem>>, vector<1x8xf32>
    tpu.vector_store %arg11[%c0_36, %c0_37], %73 {strides = array<i32>} : memref<1x8xf32, #tpu.memory_space<vmem>>, vector<1x8xf32>,
    return
  }
}

</mosaic_0001>

<bundles_post_ra>
// kernel: neural_network_forward.1
= control target key start
LH: loop header
LB: loop body
LE: loop exit
PB: predicated region body
PF: predicated region fallthrough
CT: control target
= control target key end

     0   :  { %s606_s0 = inlined_call_operand.hbm [shape: f32[8,16], index: 0, kind: input, shape index: {}]   ;;  %s607_s1 = inlined_call_operand.hbm [shape: bf16[16,32], index: 1, kind: input, shape index: {}]   ;;  %s608_s2 = inlined_call_operand.vmem [shape: f32[1,32], index: 2, kind: input, shape index: {}]   ;;  %s609_s3 = inlined_call_operand.vmem [shape: f32[1,32], index: 3, kind: input, shape index: {}]   ;;  %s610_s4 = inlined_call_operand.vmem [shape: f32[1,32], index: 4, kind: input, shape index: {}]   ;;  %s611_s5 = inlined_call_operand.vmem [shape: bf16[32,32], index: 5, kind: input, shape index: {}]   ;;  %s612_s6 = inlined_call_operand.vmem [shape: f32[1,32], index: 6, kind: input, shape index: {}]   ;;  %s613_s7 = inlined_call_operand.vmem [shape: f32[1,32], index: 7, kind: input, shape index: {}]   ;;  %s614_s8 = inlined_call_operand.vmem [shape: f32[1,32], index: 8, kind: input, shape index: {}]   ;;  %s615_s9 = inlined_call_operand.vmem [shape: f32[1,32], index: 9, kind: input, shape index: {}]   ;;  %s616_s10 = inlined_call_operand.<no memory space> [shape: f32[1,1], index: 10, kind: input, shape index: {}]   ;;  %s617_s11 = inlined_call_operand.hbm [shape: f32[1,8], index: 11, kind: output, shape index: {}]  }
   0x1   :  { %v16_v0 = vstv %s616_s10 }
   0x2   :  { %17 = vst [vmem:[#allocation2] sm:$0x1] %v16_v0 }
   0x3   :  { %18 = vsyncpa [#allocation4], 0 }
   0x4   :  { %19 = vsyncpa [#allocation7], 0 }
   0x5   :  { %20 = vsyncpa [#allocation5], 0  ;;  %s460_s19 = smov [#allocation3]   ;;  %s461_s21 = smov [#allocation6]  }
   0x6   :  { %s27_s20 = sshll.u32 %s460_s19, 4  ;;  %s36_s22 = sshll.u32 %s461_s21, 4  ;;  %s28_s20 = int_to_ptr.vmem [resolvable:$true] %s27_s20  ;;  %s530_s22 = int_to_ptr.vmem [resolvable:$true] %s36_s22 }
   0x7   :  { %s388_s25 = scalar_lea.hbm %s606_s0, 128 }
   0x8   :  { %p389_p0 = scmp.ne.s32.totalorder %s606_s0, %s388_s25  ;;  %p392_p1 = scmp.lt.u32.totalorder %s388_s25, %s606_s0 }
   0xa   :  { %p394_p2 = pnand %p392_p1, %p389_p0 }
   0xc   :  { %397 = shalt.err (!%p394_p2)
}
   0xd   :  { %s398_s29 = scalar_lea.vmem %s28_s20, 128  ;;  %p403_p4 = scmp.lt.s32.totalorder %s28_s20, %s28_s20 }
   0xe   :  { %p399_p3 = scmp.ne.s32.totalorder %s28_s20, %s398_s29  ;;  %p404_p5 = scmp.lt.s32.totalorder %s398_s29, %s398_s29 }
  0x10   :  { %p405_p6 = por %p404_p5, %p403_p4 }
  0x12   :  { %p406_p7 = pnand %p405_p6, %p399_p3 }
  0x14   :  { %409 = shalt.err (!%p406_p7)
}
  0x15   :  { %30 = dma.hbm_to_vmem [thread:$0]  %s606_s0, 128, %s28_s20, [#allocation4]  }
  0x16   :  { %s410_s15 = scalar_lea.hbm %s607_s1, 128 }
  0x17   :  { %p411_p8 = scmp.ne.s32.totalorder %s607_s1, %s410_s15  ;;  %p414_p9 = scmp.lt.u32.totalorder %s410_s15, %s607_s1 }
  0x19   :  { %p416_p10 = pnand %p414_p9, %p411_p8 }
  0x1b   :  { %419 = shalt.err (!%p416_p10)
}
  0x1c   :  { %s420_s21 = scalar_lea.vmem %s530_s22, 128  ;;  %p425_p12 = scmp.lt.s32.totalorder %s530_s22, %s530_s22 }
  0x1d   :  { %p421_p11 = scmp.ne.s32.totalorder %s530_s22, %s420_s21  ;;  %p426_p13 = scmp.lt.s32.totalorder %s420_s21, %s420_s21 }
  0x1f   :  { %p427_p0 = por %p426_p13, %p425_p12 }
  0x21   :  { %p428_p1 = pnand %p427_p0, %p421_p11 }
  0x23   :  { %431 = shalt.err (!%p428_p1)
}
  0x24   :  { %s462_s0 = smov 64   ;;  %s463_s20 = smov 4  }
  0x25   :  { %42 = dma.hbm_to_vmem [thread:$0]  %s607_s1, 128, %s530_s22, [#allocation7], %s462_s0, %s462_s0, %s463_s20  }
  0x26   :  { %454 = dma.done.wait [#allocation4], 128  }
  0x27   :  { %455 = vsyncadd [#allocation4], 4294967168 }
  0x28   :  { %456 = dma.done.wait [#allocation7], 128  }
  0x29   :  { %457 = vsyncadd [#allocation7], 4294967168  ;;  %v464_v1 = vmov 0.0   ;;  %vm465_vm0 = vmmov 0   ;;  %v381_v2 = vld [vmem:[#allocation6] sm:$0xff]   ;;  %v68_v3 = vld [vmem:[#allocation3] sm:$0xff]  ;;  %v154_v32 = vlaneseq }
  0x2a   :  { %360 = vmatprep.subr.bf16.mxu0 %v464_v1  ;;  %362 = vmatprep.mubr.msk.bf16.mxu0 %vm465_vm0, %v464_v1  ;;  %vm85_vm1 = vcmask 130048   ;;  %v69_v4 = vpack.c.bf16 %v68_v3, %v68_v3  ;;  %v382_v5 = vld [vmem:[%s611_s5] sm:$0xff]   ;;  %v383_v6 = vld [vmem:[%s611_s5 + $0x8] sm:$0xff]   ;;  %vm131_vm2 = vcmask 261120   ;;  %vm326_vm3 = vcmask 57344  }
  0x2b   :  { %366 = vmatprep.subr.bf16.mxu1 %v464_v1  ;;  %370 = vmatprep.mubr.msk.bf16.mxu1 %vm465_vm0, %v464_v1  ;;  %v344_v7 = vld [vmem:[%s608_s2] ss:$0 sm:$0xff]  ;;  %v155_v33 = vshrl.u32 %v154_v32, 7 }
  0x2c   :  { %361 = vmatpush3.bf16.msra.mxu0 %v381_v2  ;;  %367 = vmatpush3.bf16.msra.mxu1 %v382_v5  ;;  %v129_v34 = vld [vmem:[%s609_s3] sm:$0x1] }
  0x2d   :  { %368 = vmatprep.subr.bf16.mxu1 %v464_v1  ;;  %v156_v35 = vsub.s32 0, %v155_v33  ;;  %v347_v39 = vld [vmem:[%s610_s4] ss:$0 sm:$0xff] }
  0x2e   :  { %v348_v45 = vld [vmem:[%s612_s6] ss:$0 sm:$0xff] }
  0x2f   :  { %363 = vmatmul.mubr.msk.bf16.vlgmr.msra.gmra.mrb[0].mxu0 %vm85_vm1, %v69_v4 }
  0x30   :  { %369 = vmatpush3.bf16.msra.mxu1 %v383_v6  ;;  %v235_v6 = vld [vmem:[%s613_s7] sm:$0x1]  ;;  %s466_s7 = smov [#allocation8]  }
 0x102   :  { %v123_v8 = vpop.f32.mrb[0].mxu0 }
 0x103   :  { %v124_v9 = vadd.f32 %v344_v7, %v123_v8  ;;  %v364_v10 = vpop.f32.mrb[1].mxu0 }
 0x104   :  { %v126_v11 = vpop.f32.mrb[2].mxu0  ;;  %v352_v10 = vld [vmem:[%s614_s8] ss:$0 sm:$0xff]  ;;  %s334_s8 = sshll.u32 %s466_s7, 4  ;;  %s335_s8 = int_to_ptr.vmem [resolvable:$true] %s334_s8 }
 0x105   :  { %v132_v12 = vsel %vm131_vm2, %v124_v9, 0.0  ;;  %v365_v13 = vpop.f32.mrb[3].mxu0  ;;  %s432_s16 = scalar_lea.vmem %s335_s8, 16  ;;  %s436_s17 = scalar_lea.vmem %s335_s8, 32 }
 0x106   :  { %v133_v14 = vrot.slane %v132_v12, 4  ;;  %p433_p2 = scmp.ne.s32.totalorder %s335_s8, %s432_s16  ;;  %p437_p3 = scmp.lt.s32.totalorder %s335_s8, %s335_s8 }
 0x107   :  { %p438_p4 = scmp.lt.s32.totalorder %s436_s17, %s432_s16 }
 0x108   :  { %v134_v15 = vadd.f32 %v133_v14, %v132_v12 }
 0x109   :  { %p439_p5 = por %p438_p4, %p437_p3 }
 0x10a   :  { %v135_v16 = vrot.slane %v134_v15, 2 }
 0x10b   :  { %p440_p6 = pnand %p439_p5, %p433_p2 }
 0x10c   :  { %v136_v17 = vadd.f32 %v135_v16, %v134_v15  ;;  %v353_v16 = vld [vmem:[%s615_s9] ss:$0 sm:$0xff] }
 0x10e   :  { %v137_v18 = vrot.slane %v136_v17, 1 }
 0x110   :  { %v138_v19 = vadd.f32 %v137_v18, %v136_v17 }
 0x112   :  { %v140_v20 = vmul.f32 0.125, %v138_v19 }
 0x114   :  { %v141_v21 = vsub.f32 %v124_v9, %v140_v20  ;;  %v354_v20 = vld [vmem:[#allocation2] ss:$0 sm:$0xff] }
 0x116   :  { %v142_v22 = vmul.f32 %v141_v21, %v141_v21 }
 0x118   :  { %v143_v23 = vsel %vm131_vm2, %v142_v22, 0.0 }
 0x119   :  { %v144_v24 = vrot.slane %v143_v23, 4 }
 0x11b   :  { %v145_v25 = vadd.f32 %v144_v24, %v143_v23 }
 0x11d   :  { %v146_v26 = vrot.slane %v145_v25, 2 }
 0x11f   :  { %v147_v27 = vadd.f32 %v146_v26, %v145_v25 }
 0x121   :  { %v148_v28 = vrot.slane %v147_v27, 1 }
 0x123   :  { %v149_v29 = vadd.f32 %v148_v28, %v147_v27 }
 0x125   :  { %v150_v30 = vmul.f32 0.125, %v149_v29 }
 0x127   :  { %v151_v31 = vadd.f32 1e-05, %v150_v30 }
 0x129   :  { %384 = vrsqrt.f32 %v151_v31 }
 0x133   :  { %v385_v36 = vpop.eup %384 }
 0x134   :  { %v153_v37 = vmul.f32 %v385_v36, %v129_v34 }
 0x136   :  { %v157_v38 = vrot.slane %v153_v37, %v156_v35 }
 0x138   :  { %v158_v40 = vmul.f32 %v157_v38, %v141_v21 }
 0x13a   :  { %v165_v41 = vadd.f32 %v347_v39, %v158_v40 }
 0x13c   :  { %v166_v42 = vmul.f32 0.01, %v165_v41 }
 0x13e   :  { %v167_v43 = vmax.f32 %v165_v41, %v166_v42 }
 0x140   :  { %v168_v44 = vpack.c.bf16 %v167_v43, %v167_v43 }
 0x142   :  { %371 = vmatmul.mubr.msk.bf16.vlgmr.msra.gmra.mrb[0].mxu1 %vm131_vm2, %v168_v44 }
 0x215   :  { %v229_v46 = vpop.f32.mrb[0].mxu1 }
 0x216   :  { %v230_v47 = vadd.f32 %v348_v45, %v229_v46  ;;  %v372_v48 = vpop.f32.mrb[1].mxu1 }
 0x217   :  { %v232_v49 = vpop.f32.mrb[2].mxu1 }
 0x218   :  { %v237_v50 = vsel %vm131_vm2, %v230_v47, 0.0  ;;  %v373_v51 = vpop.f32.mrb[3].mxu1 }
 0x219   :  { %v238_v52 = vrot.slane %v237_v50, 4 }
 0x21b   :  { %v239_v53 = vadd.f32 %v238_v52, %v237_v50 }
 0x21d   :  { %v240_v54 = vrot.slane %v239_v53, 2 }
 0x21f   :  { %v241_v55 = vadd.f32 %v240_v54, %v239_v53 }
 0x221   :  { %v242_v56 = vrot.slane %v241_v55, 1 }
 0x223   :  { %v243_v57 = vadd.f32 %v242_v56, %v241_v55 }
 0x225   :  { %v244_v58 = vmul.f32 0.125, %v243_v57 }
 0x227   :  { %v245_v59 = vsub.f32 %v230_v47, %v244_v58 }
 0x229   :  { %v246_v60 = vmul.f32 %v245_v59, %v245_v59 }
 0x22b   :  { %v247_v61 = vsel %vm131_vm2, %v246_v60, 0.0 }
 0x22c   :  { %v248_v62 = vrot.slane %v247_v61, 4 }
 0x22e   :  { %v249_v63 = vadd.f32 %v248_v62, %v247_v61 }
 0x230   :  { %v250_v0 = vrot.slane %v249_v63, 2 }
 0x232   :  { %v251_v1 = vadd.f32 %v250_v0, %v249_v63 }
 0x234   :  { %v252_v2 = vrot.slane %v251_v1, 1 }
 0x236   :  { %v253_v3 = vadd.f32 %v252_v2, %v251_v1 }
 0x238   :  { %v254_v4 = vmul.f32 0.125, %v253_v3 }
 0x23a   :  { %v255_v5 = vadd.f32 1e-05, %v254_v4 }
 0x23c   :  { %386 = vrsqrt.f32 %v255_v5 }
 0x246   :  { %v387_v7 = vpop.eup %386 }
 0x247   :  { %v257_v8 = vmul.f32 %v387_v7, %v235_v6 }
 0x249   :  { %v261_v9 = vrot.slane %v257_v8, %v156_v35 }
 0x24b   :  { %v262_v11 = vmul.f32 %v261_v9, %v245_v59 }
 0x24d   :  { %v269_v12 = vadd.f32 %v352_v10, %v262_v11 }
 0x24f   :  { %v270_v13 = vmul.f32 0.01, %v269_v12 }
 0x251   :  { %v271_v14 = vmax.f32 %v269_v12, %v270_v13 }
 0x253   :  { %v272_v15 = vpack.c.bf16 %v271_v14, %v271_v14 }
 0x255   :  { %v274_v17 = vunpack.c.l.bf16 %v272_v15 }
 0x257   :  { %v281_v18 = vmul.f32 %v353_v16, %v274_v17 }
 0x259   :  { %v282_v19 = vsel %vm131_vm2, %v281_v18, 0.0 }
 0x25a   :  { %283 = vadd.xlane.f32.xlu0 %v282_v19 }
 0x2e7   :  { %v284_v21 = vpop.xlane.xlu0 %283 }
 0x2e8   :  { %v292_v22 = vadd.f32 %v354_v20, %v284_v21 }
 0x2ea   :  { %v293_v23 = vmin.f32 %v292_v22, 100.0 }
 0x2ec   :  { %294 = vxpose.xlu0.b32.start.end [1/1] (short) (narrow) %v293_v23, 8 }
 0x36c   :  { %v310_v24 = vpop.trf.xlu0 }
 0x36d   :  { %327 = vst.msk [vmem:[#allocation8] sm:$0x1] %vm326_vm3, %v310_v24 }
 0x36e   :  { %443 = shalt.err (!%p440_p6)
}
 0x36f   :  { %s444_s19 = scalar_lea.hbm %s617_s11, 16 }
 0x370   :  { %p445_p7 = scmp.ne.s32.totalorder %s617_s11, %s444_s19  ;;  %p448_p8 = scmp.lt.u32.totalorder %s444_s19, %s617_s11 }
 0x372   :  { %p450_p9 = pnand %p448_p8, %p445_p7 }
 0x374   :  { %453 = shalt.err (!%p450_p9)
}
 0x375   :  { %337 = dma.vmem_to_hbm [thread:$0]  %s335_s8, 16, %s617_s11, [#allocation5]  }
 0x376   :  { %458 = dma.done.wait [#allocation5], 16  }
 0x377   :  { %459 = vsyncadd [#allocation5], 4294967280 }
 0x378   :  { %341 = vsyncpa [#allocation4], 1 }
 0x379   :  { %342 = vsyncpa [#allocation7], 1 }
 0x37a   :  { %343 = vsyncpa [#allocation5], 1 }

</bundles_post_ra>
